<compile_context>
chip_gen: v5e
topology: v5e:2x2
jax: 0.10.0
libtpu: 0.0.40
codegen_flags: <defaults>
</compile_context>

<pallas_src>
import functools

import jax
import jax.numpy as jnp
from jax.experimental import pallas as pl
from jax.experimental.pallas import tpu as pltpu

_LANE = 128      # lane width of a vreg (last dim)
_SUBLANE = 8     # sublane count (second-to-last dim)


def _round_up(x, m):
    return ((x + m - 1) // m) * m


def _mlp_kernel(x_ref,
                w1_ref, b1_ref,
                w2_ref, b2_ref,
                wh_ref, bh_ref,
                out_ref):
    """Fused forward: relu(relu(x@W1+b1)@W2+b2) @ [W3|W4] + [b3|b4].

    Matmuls run in the weight dtype (bf16 or f32) with f32 accumulation;
    bias-add / ReLU are f32 on the VPU.
    """
    x = x_ref[...].astype(w1_ref.dtype)                       # (TB, IN) in-kernel cast

    # l1 + ReLU
    h = jnp.dot(x, w1_ref[...], preferred_element_type=jnp.float32)
    h = jnp.maximum(h + b1_ref[...], 0.0)                     # (TB, HID_P) f32

    # l2 + ReLU
    h = jnp.dot(h.astype(w2_ref.dtype), w2_ref[...],
                preferred_element_type=jnp.float32)
    h = jnp.maximum(h + b2_ref[...], 0.0)

    # fused heads l3|l4 -> single lane-dense store
    o = jnp.dot(h.astype(wh_ref.dtype), wh_ref[...],
                preferred_element_type=jnp.float32)
    out_ref[...] = (o + bh_ref[...]).astype(out_ref.dtype)    # (TB, OUT_P)


def prepare_params(params, matmul_dtype=jnp.bfloat16):
    """One-time weight preparation (hoisted out of the per-call path).

    Pads feature dims to lane multiples (128), fuses the two heads into one
    matmul ([W3|W4], [b3|b4]) and casts weights to the matmul dtype. Biases
    stay f32 (added on the VPU).
    """
    hidden = params["w1"].shape[1]
    num_classes = params["w3"].shape[1]
    constraint_classes = params["w4"].shape[1]

    hid_p = _round_up(hidden, _LANE)
    out_p = _round_up(num_classes + constraint_classes, _LANE)

    def pad2(a, rows, cols, dtype):
        return jnp.pad(a, ((0, rows - a.shape[0]),
                           (0, cols - a.shape[1]))).astype(dtype)

    in_sz = params["w1"].shape[0]
    return {
        # W1 rows stay unpadded: x is passed with its real feature width.
        "w1": pad2(params["w1"], in_sz, hid_p, matmul_dtype),
        "b1": pad2(params["b1"], 1, hid_p, jnp.float32),
        "w2": pad2(params["w2"], hid_p, hid_p, matmul_dtype),
        "b2": pad2(params["b2"], 1, hid_p, jnp.float32),
        "wh": pad2(jnp.concatenate([params["w3"], params["w4"]], axis=1),
                   hid_p, out_p, matmul_dtype),
        "bh": pad2(jnp.concatenate([params["b3"], params["b4"]], axis=1),
                   1, out_p, jnp.float32),
    }


@functools.partial(
    jax.jit,
    static_argnames=("num_classes", "constraint_classes", "block_b",
                     "out_dtype"))
def neural_net_forward(x, prepped, *, num_classes, constraint_classes,
                       block_b=2048, out_dtype=jnp.bfloat16):
    """Run the fused MLP kernel.

    x: (B, input_size) float32 (unpadded).
    prepped: output of prepare_params().
    Returns (out1, out2) = (B, num_classes), (B, constraint_classes).
    """
    B, input_size = x.shape
    hid_p = prepped["w1"].shape[1]
    out_p = prepped["wh"].shape[1]
    w_itemsize = jnp.dtype(prepped["w1"].dtype).itemsize
    o_itemsize = jnp.dtype(out_dtype).itemsize

    # Batch tile: as large as block_b allows, but keep >= 2 grid steps when B
    # permits so v7x's two TensorCores both get work ("parallel" axis).
    tb = min(block_b, _round_up(max(pl.cdiv(B, 2), 1), _SUBLANE))
    tb = max(tb, _SUBLANE)
    grid = (pl.cdiv(B, tb),)          # ragged final block handled by Pallas

    flops = 2 * B * (input_size * hid_p + hid_p * hid_p + hid_p * out_p)
    bytes_accessed = (
        B * input_size * 4                                          # x (f32)
        + (input_size * hid_p + hid_p * hid_p + hid_p * out_p) * w_itemsize
        + (2 * hid_p + out_p) * 4                                   # biases
        + B * out_p * o_itemsize                                    # output
    )

    out = pl.pallas_call(
        _mlp_kernel,
        out_shape=jax.ShapeDtypeStruct((B, out_p), out_dtype),
        grid=grid,
        in_specs=[
            pl.BlockSpec((tb, input_size), lambda i: (i, 0)),  # x: batch-tiled,
                                                               # full last dim
            pl.BlockSpec((input_size, hid_p), lambda i: (0, 0)),  # weights stay
            pl.BlockSpec((1, hid_p), lambda i: (0, 0)),           # resident in
            pl.BlockSpec((hid_p, hid_p), lambda i: (0, 0)),       # VMEM across
            pl.BlockSpec((1, hid_p), lambda i: (0, 0)),           # grid steps
            pl.BlockSpec((hid_p, out_p), lambda i: (0, 0)),
            pl.BlockSpec((1, out_p), lambda i: (0, 0)),
        ],
        out_specs=pl.BlockSpec((tb, out_p), lambda i: (i, 0)),
        compiler_params=pltpu.CompilerParams(
            dimension_semantics=("parallel",)),                # megacore shard
        cost_estimate=pl.CostEstimate(
            flops=flops, transcendentals=0, bytes_accessed=bytes_accessed),
    )(x, prepped["w1"], prepped["b1"], prepped["w2"], prepped["b2"],
      prepped["wh"], prepped["bh"])

    out1 = out[:, :num_classes]
    out2 = out[:, num_classes:num_classes + constraint_classes]
    return out1, out2


def init_params(key, input_size, hidden_size, num_classes, constraint_classes):
    """Deterministic synthetic parameter init (shapes match nn.Linear)."""
    ks = jax.random.split(key, 8)

    def linear(kw, kb, fan_in, fan_out):
        # Match PyTorch's default U(-1/sqrt(fan_in), 1/sqrt(fan_in)) init.
        bound = 1.0 / jnp.sqrt(fan_in)
        w = jax.random.uniform(kw, (fan_in, fan_out), jnp.float32, -bound, bound)
        b = jax.random.uniform(kb, (1, fan_out), jnp.float32, -bound, bound)
        return w, b

    w1, b1 = linear(ks[0], ks[1], input_size, hidden_size)
    w2, b2 = linear(ks[2], ks[3], hidden_size, hidden_size)
    w3, b3 = linear(ks[4], ks[5], hidden_size, num_classes)
    w4, b4 = linear(ks[6], ks[7], hidden_size, constraint_classes)
    return {"w1": w1, "b1": b1, "w2": w2, "b2": b2,
            "w3": w3, "b3": b3, "w4": w4, "b4": b4}


def reference_forward(x, p):
    """Pure-JAX reference for correctness checking."""
    h = jnp.maximum(x @ p["w1"] + p["b1"], 0.0)
    h = jnp.maximum(h @ p["w2"] + p["b2"], 0.0)
    return h @ p["w3"] + p["b3"], h @ p["w4"] + p["b4"]


if __name__ == "__main__":
    key = jax.random.PRNGKey(0)
    k_x, k_p = jax.random.split(key)

    input_size = 32
    hidden_size = 32
    num_classes = 16
    constraint_classes = 8
    params = init_params(k_p, input_size, hidden_size, num_classes,
                         constraint_classes)

    # 1) Exact f32 matmul + f32 output path (tight check), batch multiple of 8.
    prepped_f32 = prepare_params(params, matmul_dtype=jnp.float32)
    x8 = jax.random.normal(k_x, (8, input_size), jnp.float32)
    o1, o2 = neural_net_forward(
        x8, prepped_f32, num_classes=num_classes,
        constraint_classes=constraint_classes, out_dtype=jnp.float32)
    o1, o2 = jax.block_until_ready((o1, o2))
    r1, r2 = reference_forward(x8, params)
    assert o1.shape == (8, num_classes)
    assert o2.shape == (8, constraint_classes)
    assert jnp.allclose(o1, r1, atol=1e-4, rtol=1e-5)
    assert jnp.allclose(o2, r2, atol=1e-4, rtol=1e-5)

    # 2) bf16 matmul + bf16 output path (the performance configuration); the
    #    ragged batch (B=10, TB=8 -> 2 grid steps, partial final block)
    #    exercises the no-batch-pad tiling path. Looser tolerance for bf16.
    prepped_bf16 = prepare_params(params, matmul_dtype=jnp.bfloat16)
    x10 = jax.random.normal(k_x, (10, input_size), jnp.float32)
    o1, o2 = neural_net_forward(
        x10, prepped_bf16, num_classes=num_classes,
        constraint_classes=constraint_classes, out_dtype=jnp.bfloat16)
    o1, o2 = jax.block_until_ready((o1, o2))
    r1, r2 = reference_forward(x10, params)
    assert o1.shape == (10, num_classes)
    assert o2.shape == (10, constraint_classes)
    assert jnp.allclose(o1.astype(jnp.float32), r1, atol=5e-2, rtol=5e-2)
    assert jnp.allclose(o2.astype(jnp.float32), r2, atol=5e-2, rtol=5e-2)

    print("KERNEL_OK")
</pallas_src>

<mosaic_0001>
module attributes {stable_mosaic.version = 11 : i64} {
  func.func @_mlp_kernel(%arg0: i32, %arg1: memref<8x32xf32, #tpu.memory_space<vmem>>, %arg2: memref<32x128xf32, #tpu.memory_space<vmem>>, %arg3: memref<1x128xf32, #tpu.memory_space<vmem>>, %arg4: memref<128x128xf32, #tpu.memory_space<vmem>>, %arg5: memref<1x128xf32, #tpu.memory_space<vmem>>, %arg6: memref<128x128xf32, #tpu.memory_space<vmem>>, %arg7: memref<1x128xf32, #tpu.memory_space<vmem>>, %arg8: memref<8x128xf32, #tpu.memory_space<vmem>>) attributes {dimension_semantics = [#tpu.dimension_semantics<parallel>], iteration_bounds = array<i64: 1>, scalar_prefetch = 0 : i64, scratch_operands = 0 : i64, tpu.core_type = #tpu.core_type<tc>, window_params = [{transform_indices = @transform_0, window_bounds = array<i64: 8, 32>}, {pipeline_mode = #tpu.pipeline_mode<synchronous>, transform_indices = @transform_1, window_bounds = array<i64: 32, 128>}, {pipeline_mode = #tpu.pipeline_mode<synchronous>, transform_indices = @transform_2, window_bounds = array<i64: 1, 128>}, {pipeline_mode = #tpu.pipeline_mode<synchronous>, transform_indices = @transform_3, window_bounds = array<i64: 128, 128>}, {pipeline_mode = #tpu.pipeline_mode<synchronous>, transform_indices = @transform_4, window_bounds = array<i64: 1, 128>}, {pipeline_mode = #tpu.pipeline_mode<synchronous>, transform_indices = @transform_5, window_bounds = array<i64: 128, 128>}, {pipeline_mode = #tpu.pipeline_mode<synchronous>, transform_indices = @transform_6, window_bounds = array<i64: 1, 128>}, {transform_indices = @transform_7, window_bounds = array<i64: 8, 128>}]} {
    %c0 = arith.constant 0 : index
    %c0_0 = arith.constant 0 : index
    %0 = vector.load %arg1[%c0, %c0_0] : memref<8x32xf32, #tpu.memory_space<vmem>>, vector<8x32xf32>
    %c0_1 = arith.constant 0 : index
    %c0_2 = arith.constant 0 : index
    %1 = vector.load %arg2[%c0_1, %c0_2] : memref<32x128xf32, #tpu.memory_space<vmem>>, vector<32x128xf32>
    %cst = arith.constant dense<0.000000e+00> : vector<8x128xf32>
    %2 = tpu.matmul %0, %1, %cst {dimension_numbers = #tpu.dot_dimension_numbers<[1], [0], [0], [1], [0, 0, 1, 1], [], []>} : vector<8x32xf32>, vector<32x128xf32>, vector<8x128xf32> -> vector<8x128xf32>
    %c0_3 = arith.constant 0 : index
    %c0_4 = arith.constant 0 : index
    %3 = vector.load %arg3[%c0_3, %c0_4] : memref<1x128xf32, #tpu.memory_space<vmem>>, vector<1x128xf32>
    %4 = vector.broadcast %3 : vector<1x128xf32> to vector<8x128xf32>
    %5 = arith.addf %2, %4 : vector<8x128xf32>
    %cst_5 = arith.constant 0.000000e+00 : f32
    %6 = vector.broadcast %cst_5 : f32 to vector<8x128xf32>
    %7 = arith.maximumf %5, %6 : vector<8x128xf32>
    %c0_6 = arith.constant 0 : index
    %c0_7 = arith.constant 0 : index
    %8 = vector.load %arg4[%c0_6, %c0_7] : memref<128x128xf32, #tpu.memory_space<vmem>>, vector<128x128xf32>
    %cst_8 = arith.constant dense<0.000000e+00> : vector<8x128xf32>
    %9 = tpu.matmul %7, %8, %cst_8 {dimension_numbers = #tpu.dot_dimension_numbers<[1], [0], [0], [1], [0, 0, 1, 1], [], []>} : vector<8x128xf32>, vector<128x128xf32>, vector<8x128xf32> -> vector<8x128xf32>
    %c0_9 = arith.constant 0 : index
    %c0_10 = arith.constant 0 : index
    %10 = vector.load %arg5[%c0_9, %c0_10] : memref<1x128xf32, #tpu.memory_space<vmem>>, vector<1x128xf32>
    %11 = vector.broadcast %10 : vector<1x128xf32> to vector<8x128xf32>
    %12 = arith.addf %9, %11 : vector<8x128xf32>
    %cst_11 = arith.constant 0.000000e+00 : f32
    %13 = vector.broadcast %cst_11 : f32 to vector<8x128xf32>
    %14 = arith.maximumf %12, %13 : vector<8x128xf32>
    %c0_12 = arith.constant 0 : index
    %c0_13 = arith.constant 0 : index
    %15 = vector.load %arg6[%c0_12, %c0_13] : memref<128x128xf32, #tpu.memory_space<vmem>>, vector<128x128xf32>
    %cst_14 = arith.constant dense<0.000000e+00> : vector<8x128xf32>
    %16 = tpu.matmul %14, %15, %cst_14 {dimension_numbers = #tpu.dot_dimension_numbers<[1], [0], [0], [1], [0, 0, 1, 1], [], []>} : vector<8x128xf32>, vector<128x128xf32>, vector<8x128xf32> -> vector<8x128xf32>
    %c0_15 = arith.constant 0 : index
    %c0_16 = arith.constant 0 : index
    %17 = vector.load %arg7[%c0_15, %c0_16] : memref<1x128xf32, #tpu.memory_space<vmem>>, vector<1x128xf32>
    %18 = vector.broadcast %17 : vector<1x128xf32> to vector<8x128xf32>
    %19 = arith.addf %16, %18 : vector<8x128xf32>
    %c0_17 = arith.constant 0 : index
    %c0_18 = arith.constant 0 : index
    %20 = vector.load %arg8[%c0_17, %c0_18] : memref<8x128xf32, #tpu.memory_space<vmem>>, vector<8x128xf32>
    tpu.vector_store %arg8[%c0_17, %c0_18], %19 {strides = array<i32>} : memref<8x128xf32, #tpu.memory_space<vmem>>, vector<8x128xf32>,
    return
  }
  func.func @transform_0(%arg0: i32) -> (i32, i32) {
    %c0_i32 = arith.constant 0 : i32
    %c0_i32_0 = arith.constant 0 : i32
    return %arg0, %c0_i32 : i32, i32
  }
  func.func @transform_1(%arg0: i32) -> (i32, i32) {
    %c0_i32 = arith.constant 0 : i32
    %c0_i32_0 = arith.constant 0 : i32
    %c0_i32_1 = arith.constant 0 : i32
    return %c0_i32, %c0_i32_0 : i32, i32
  }
  func.func @transform_2(%arg0: i32) -> (i32, i32) {
    %c0_i32 = arith.constant 0 : i32
    %c0_i32_0 = arith.constant 0 : i32
    %c0_i32_1 = arith.constant 0 : i32
    return %c0_i32, %c0_i32_0 : i32, i32
  }
  func.func @transform_3(%arg0: i32) -> (i32, i32) {
    %c0_i32 = arith.constant 0 : i32
    %c0_i32_0 = arith.constant 0 : i32
    %c0_i32_1 = arith.constant 0 : i32
    return %c0_i32, %c0_i32_0 : i32, i32
  }
  func.func @transform_4(%arg0: i32) -> (i32, i32) {
    %c0_i32 = arith.constant 0 : i32
    %c0_i32_0 = arith.constant 0 : i32
    %c0_i32_1 = arith.constant 0 : i32
    return %c0_i32, %c0_i32_0 : i32, i32
  }
  func.func @transform_5(%arg0: i32) -> (i32, i32) {
    %c0_i32 = arith.constant 0 : i32
    %c0_i32_0 = arith.constant 0 : i32
    %c0_i32_1 = arith.constant 0 : i32
    return %c0_i32, %c0_i32_0 : i32, i32
  }
  func.func @transform_6(%arg0: i32) -> (i32, i32) {
    %c0_i32 = arith.constant 0 : i32
    %c0_i32_0 = arith.constant 0 : i32
    %c0_i32_1 = arith.constant 0 : i32
    return %c0_i32, %c0_i32_0 : i32, i32
  }
  func.func @transform_7(%arg0: i32) -> (i32, i32) {
    %c0_i32 = arith.constant 0 : i32
    %c0_i32_0 = arith.constant 0 : i32
    return %arg0, %c0_i32 : i32, i32
  }
}

</mosaic_0001>

<bundles_post_ra>
// kernel: neural_net_forward.1
= control target key start
LH: loop header
LB: loop body
LE: loop exit
PB: predicated region body
PF: predicated region fallthrough
CT: control target
= control target key end

     0   :  { %12 = vsyncpa [#allocation3], 0  ;;  %s431_s0 = inlined_call_operand.hbm [shape: f32[8,32], index: 0, kind: input, shape index: {}]   ;;  %s432_s1 = inlined_call_operand.hbm [shape: f32[32,128], index: 1, kind: input, shape index: {}]   ;;  %s433_s2 = inlined_call_operand.hbm [shape: f32[1,128], index: 2, kind: input, shape index: {}]   ;;  %s434_s3 = inlined_call_operand.hbm [shape: f32[128,128], index: 3, kind: input, shape index: {}]   ;;  %s435_s4 = inlined_call_operand.vmem [shape: f32[1,128], index: 4, kind: input, shape index: {}]   ;;  %s436_s5 = inlined_call_operand.hbm [shape: f32[128,128], index: 5, kind: input, shape index: {}]   ;;  %s437_s6 = inlined_call_operand.vmem [shape: f32[1,128], index: 6, kind: input, shape index: {}]   ;;  %s438_s7 = inlined_call_operand.vmem [shape: f32[8,128], index: 7, kind: output, shape index: {}]  }
   0x1   :  { %13 = vsyncpa [#allocation5], 0  ;;  %s30_s26 = sshll.u32 %s432_s1, 4  ;;  %s31_s26 = int_to_ptr.hbm [resolvable:$true] %s30_s26 }
   0x2   :  { %14 = vsyncpa [#allocation8], 0  ;;  %s360_s27 = smov [#allocation4]   ;;  %s54_s8 = sshll.u32 %s434_s3, 4  ;;  %s55_s8 = int_to_ptr.hbm [resolvable:$true] %s54_s8 }
   0x3   :  { %s32_s28 = sshll.u32 %s360_s27, 4  ;;  %s361_s9 = smov 128   ;;  %s33_s28 = int_to_ptr.vmem [resolvable:$true] %s32_s28 }
   0x4   :  { %s362_s10 = smov 8   ;;  %s363_s11 = smov [#allocation7]  }
   0x5   :  { %38 = dma.hbm_to_vmem [thread:$0]  %s31_s26, 512, %s33_s28, [#allocation5], %s361_s9, %s361_s9, %s362_s10  }
   0x6   :  { %s56_s12 = sshll.u32 %s363_s11, 4  ;;  %s20_s15 = sshll.u32 %s431_s0, 4  ;;  %s57_s12 = int_to_ptr.vmem [resolvable:$true] %s56_s12  ;;  %s21_s15 = int_to_ptr.hbm [resolvable:$true] %s20_s15 }
   0x7   :  { %62 = dma.hbm_to_vmem [thread:$0]  %s55_s8, 2048, %s57_s12, [#allocation8], %s361_s9, %s361_s9, %s362_s10  }
   0x8   :  { %s44_s17 = sshll.u32 %s433_s2, 4  ;;  %s364_s18 = smov [#allocation2]   ;;  %s45_s17 = int_to_ptr.hbm [resolvable:$true] %s44_s17 }
   0x9   :  { %s22_s19 = sshll.u32 %s364_s18, 4  ;;  %s365_s3 = smov [#allocation6]   ;;  %s23_s19 = int_to_ptr.vmem [resolvable:$true] %s22_s19 }
   0xa   :  { %25 = dma.hbm_to_vmem [thread:$0]  %s21_s15, 128, %s23_s19, [#allocation3]  }
   0xb   :  { %s46_s20 = sshll.u32 %s365_s3, 4  ;;  %s69_s23 = sshll.u32 %s436_s5, 4  ;;  %s47_s20 = int_to_ptr.vmem [resolvable:$true] %s46_s20  ;;  %s70_s23 = int_to_ptr.hbm [resolvable:$true] %s69_s23 }
   0xc   :  { %49 = dma.hbm_to_vmem [thread:$0]  %s45_s17, 16, %s47_s20, [#allocation5]  }
   0xd   :  { %s366_s0 = smov [#allocation9]  }
   0xe   :  { %s71_s24 = sshll.u32 %s366_s0, 4  ;;  %s72_s24 = int_to_ptr.vmem [resolvable:$true] %s71_s24 }
   0xf   :  { %77 = dma.hbm_to_vmem [thread:$0]  %s70_s23, 2048, %s72_s24, [#allocation8], %s361_s9, %s361_s9, %s362_s10  }
  0x10   :  { %354 = dma.done.wait [#allocation3], 128  }
  0x11   :  { %355 = vsyncadd [#allocation3], 4294967168 }
  0x12   :  { %356 = dma.done.wait [#allocation5], 528  }
  0x13   :  { %357 = vsyncadd [#allocation5], 4294966768 }
  0x14   :  { %358 = dma.done.wait [#allocation8], 4096  }
  0x15   :  { %359 = vsyncadd [#allocation8], 4294963200  ;;  %v104_v0 = vld [vmem:[#allocation4 + $0x18] sm:$0xff]  ;;  %v103_v1 = vld [vmem:[#allocation4 + $0x10] sm:$0xff]  ;;  %vm109_vm0 = vcmask 261120  }
  0x16   :  { %125 = vmatpush.msra.mxu0 %v104_v0  ;;  %v149_v2 = vld [vmem:[#allocation7 + $0x78] sm:$0xff]  ;;  %v102_v3 = vld [vmem:[#allocation4 + $0x8] sm:$0xff]  ;;  %v148_v4 = vld [vmem:[#allocation7 + $0x70] sm:$0xff] }
  0x17   :  { %154 = vmatpush.msra.mxu1 %v149_v2  ;;  %v147_v5 = vld [vmem:[#allocation7 + $0x68] sm:$0xff]  ;;  %v101_v6 = vld [vmem:[#allocation4] sm:$0xff]  ;;  %v100_v7 = vld [vmem:[#allocation2] sm:$0xff] }
  0x18   :  { %126 = vmatpush.msra.mxu0 %v103_v1  ;;  %v146_v8 = vld [vmem:[#allocation7 + $0x60] sm:$0xff]  ;;  %v145_v9 = vld [vmem:[#allocation7 + $0x58] sm:$0xff]  ;;  %v144_v10 = vld [vmem:[#allocation7 + $0x50] sm:$0xff] }
  0x19   :  { %155 = vmatpush.msra.mxu1 %v148_v4  ;;  %v143_v11 = vld [vmem:[#allocation7 + $0x48] sm:$0xff]  ;;  %v142_v12 = vld [vmem:[#allocation7 + $0x40] sm:$0xff]  ;;  %v141_v13 = vld [vmem:[#allocation7 + $0x38] sm:$0xff] }
  0x1a   :  { %127 = vmatpush.msra.mxu0 %v102_v3  ;;  %v140_v14 = vld [vmem:[#allocation7 + $0x30] sm:$0xff]  ;;  %v139_v15 = vld [vmem:[#allocation7 + $0x28] sm:$0xff]  ;;  %v138_v16 = vld [vmem:[#allocation7 + $0x20] sm:$0xff] }
  0x1b   :  { %156 = vmatpush.msra.mxu1 %v147_v5  ;;  %v137_v17 = vld [vmem:[#allocation7 + $0x18] sm:$0xff]  ;;  %v136_v18 = vld [vmem:[#allocation7 + $0x10] sm:$0xff]  ;;  %v135_v19 = vld [vmem:[#allocation7 + $0x8] sm:$0xff] }
  0x1c   :  { %128 = vmatpush.msra.mxu0 %v101_v6  ;;  %v134_v20 = vld [vmem:[#allocation7] sm:$0xff]  ;;  %v190_v21 = vld [vmem:[#allocation9 + $0x78] sm:$0xff]  ;;  %v189_v22 = vld [vmem:[#allocation9 + $0x70] sm:$0xff] }
  0x1d   :  { %223 = vmatmul.msk.f32.vlgmr.msra.gmra.mxu0 %vm109_vm0, %v100_v7  ;;  %157 = vmatpush.msra.mxu1 %v146_v8  ;;  %v188_v23 = vld [vmem:[#allocation9 + $0x68] sm:$0xff]  ;;  %v187_v24 = vld [vmem:[#allocation9 + $0x60] sm:$0xff]  ;;  %v186_v25 = vld [vmem:[#allocation9 + $0x58] sm:$0xff] }
  0x1e   :  { %195 = vmatpush.msra.mxu2 %v190_v21  ;;  %v185_v26 = vld [vmem:[#allocation9 + $0x50] sm:$0xff]  ;;  %v184_v27 = vld [vmem:[#allocation9 + $0x48] sm:$0xff]  ;;  %v183_v28 = vld [vmem:[#allocation9 + $0x40] sm:$0xff] }
  0x1f   :  { %158 = vmatpush.msra.mxu1 %v145_v9  ;;  %v182_v29 = vld [vmem:[#allocation9 + $0x38] sm:$0xff]  ;;  %v181_v30 = vld [vmem:[#allocation9 + $0x30] sm:$0xff]  ;;  %v180_v31 = vld [vmem:[#allocation9 + $0x28] sm:$0xff] }
  0x20   :  { %196 = vmatpush.msra.mxu2 %v189_v22  ;;  %v179_v32 = vld [vmem:[#allocation9 + $0x20] sm:$0xff]  ;;  %v178_v33 = vld [vmem:[#allocation9 + $0x18] sm:$0xff]  ;;  %v177_v38 = vld [vmem:[#allocation9 + $0x10] sm:$0xff] }
  0x21   :  { %159 = vmatpush.msra.mxu1 %v144_v10  ;;  %v231_v34 = vld [vmem:[#allocation6] ss:$0 sm:$0xff]  ;;  %v176_v39 = vld [vmem:[#allocation9 + $0x8] sm:$0xff]  ;;  %v175_v40 = vld [vmem:[#allocation9] sm:$0xff] }
  0x22   :  { %197 = vmatpush.msra.mxu2 %v188_v23  ;;  %v232_v41 = vld [vmem:[%s435_s4] ss:$0 sm:$0xff] }
  0x23   :  { %160 = vmatpush.msra.mxu1 %v143_v11  ;;  %v233_v45 = vld [vmem:[%s437_s6] ss:$0 sm:$0xff] }
  0x24   :  { %198 = vmatpush.msra.mxu2 %v187_v24 }
  0x25   :  { %161 = vmatpush.msra.mxu1 %v142_v12 }
  0x26   :  { %199 = vmatpush.msra.mxu2 %v186_v25 }
  0x27   :  { %162 = vmatpush.msra.mxu1 %v141_v13 }
  0x28   :  { %200 = vmatpush.msra.mxu2 %v185_v26 }
  0x29   :  { %163 = vmatpush.msra.mxu1 %v140_v14 }
  0x2a   :  { %201 = vmatpush.msra.mxu2 %v184_v27 }
  0x2b   :  { %164 = vmatpush.msra.mxu1 %v139_v15 }
  0x2c   :  { %202 = vmatpush.msra.mxu2 %v183_v28 }
  0x2d   :  { %165 = vmatpush.msra.mxu1 %v138_v16 }
  0x2e   :  { %203 = vmatpush.msra.mxu2 %v182_v29 }
  0x2f   :  { %166 = vmatpush.msra.mxu1 %v137_v17 }
  0x30   :  { %204 = vmatpush.msra.mxu2 %v181_v30 }
  0x31   :  { %167 = vmatpush.msra.mxu1 %v136_v18 }
  0x32   :  { %205 = vmatpush.msra.mxu2 %v180_v31 }
  0x33   :  { %168 = vmatpush.msra.mxu1 %v135_v19 }
  0x34   :  { %206 = vmatpush.msra.mxu2 %v179_v32 }
  0x35   :  { %169 = vmatpush.msra.mxu1 %v134_v20 }
  0x36   :  { %207 = vmatpush.msra.mxu2 %v178_v33 }
  0x38   :  { %208 = vmatpush.msra.mxu2 %v177_v38 }
  0x3a   :  { %209 = vmatpush.msra.mxu2 %v176_v39 }
  0x3c   :  { %210 = vmatpush.msra.mxu2 %v175_v40 }
  0x9a   :  { %v130_v35 = vpop.f32.mrf.mxu0 }
  0x9b   :  { %v131_v36 = vadd.f32 %v231_v34, %v130_v35 }
  0x9d   :  { %v133_v37 = vmax.f32 %v131_v36, 0.0 }
  0x9f   :  { %170 = vmatmul.f32.vlgmr.msra.gmra.mxu1 %v133_v37 }
 0x11c   :  { %v171_v42 = vpop.f32.mrf.mxu1 }
 0x11d   :  { %v172_v43 = vadd.f32 %v232_v41, %v171_v42 }
 0x11f   :  { %v174_v44 = vmax.f32 %v172_v43, 0.0 }
 0x121   :  { %211 = vmatmul.f32.vlgmr.msra.gmra.mxu2 %v174_v44 }
 0x1a4   :  { %v212_v46 = vpop.f32.mrf.mxu2 }
 0x1a5   :  { %v213_v47 = vadd.f32 %v233_v45, %v212_v46 }
 0x1a7   :  { %215 = vst [vmem:[%s438_s7] sm:$0xff] %v213_v47 }
 0x1a8   :  { %220 = vsyncpa [#allocation3], 1 }
 0x1a9   :  { %221 = vsyncpa [#allocation5], 1 }
 0x1aa   :  { %222 = vsyncpa [#allocation8], 1 }

</bundles_post_ra>
